<compile_context>
chip_gen: v6e
topology: v6e:2x2x1
jax: 0.10.0
libtpu: 0.0.40
codegen_flags: <defaults>
</compile_context>

<pallas_src>
import numpy as np

import jax
import jax.numpy as jnp
from jax.experimental import pallas as pl
from jax.experimental.pallas import tpu as pltpu

_LANE = 128                              # vreg lane width
_ROW_ALIGN = 32                          # sublane-safe row-tile multiple
_MIN_GRID_STEPS = 4                      # >= 2 steps per TensorCore on v7x
_TARGET_TILE_BYTES = 6 * 1024 * 1024     # per-input-tile payload (v5e 4 / v6e 4-8 / v7x 6-8 MiB)
_VMEM_LIMIT_BYTES = 48 * 1024 * 1024     # 2x(in)+2x(out) 6 MiB buffers + headroom; < v7x 64 MiB
_XLA_FALLBACK_BYTES = 128 * 1024         # below this, plain XLA beats kernel launch overhead


def _cdiv(a: int, b: int) -> int:
    return -(-a // b)


def _round_up(a: int, b: int) -> int:
    return _cdiv(a, b) * b


def _l2norm_plain_kernel(x_ref, o_ref):
    """Each physical row of the tile is one logical row of length D."""
    xf = x_ref[...].astype(jnp.float32)                    # (tile_rows, D)
    ss = jnp.sum(xf * xf, axis=1, keepdims=True)           # f32 accumulation (XLU reduce)
    o_ref[...] = (xf * jax.lax.rsqrt(ss)).astype(o_ref.dtype)


def _l2norm_packed_kernel(grp_ref, x_ref, o_ref):
    """Each 128-lane physical row holds k logical rows of length D (lane-dense).

    grp is a block-diagonal 0/1 matrix (VMEM-resident across grid steps): one MXU
    matmul both reduces each group's sum-of-squares and broadcasts it back across
    that group's D lanes, avoiding in-kernel relayouts and masked stores.
    """
    xf = x_ref[...].astype(jnp.float32)                    # (tile_rows, 128)
    x2 = xf * xf
    ss = jnp.dot(x2, grp_ref[...],
                 preferred_element_type=jnp.float32,
                 precision=jax.lax.Precision.HIGHEST)      # keep x2 at full precision
    o_ref[...] = (xf * jax.lax.rsqrt(ss)).astype(o_ref.dtype)


def _l2_norm_xla(x: jax.Array) -> jax.Array:
    xf = x.astype(jnp.float32)
    ss = jnp.sum(xf * xf, axis=1, keepdims=True)
    return (xf * jax.lax.rsqrt(ss)).astype(x.dtype)


def l2_norm(x: jax.Array, *,
            target_tile_bytes: int = _TARGET_TILE_BYTES,
            force_pallas: bool = False) -> jax.Array:
    """Row-wise L2 normalization over dim=1 of a 2-D array [N, D]."""
    assert x.ndim == 2, "L2Norm kernel expects [N, D] input"
    n, d = x.shape
    if n == 0 or d == 0:
        return x
    itemsize = jnp.dtype(x.dtype).itemsize

    # Tiny inputs: fused XLA elementwise is strictly faster than kernel launch.
    if not force_pallas and n * d * itemsize <= _XLA_FALLBACK_BYTES:
        return _l2_norm_xla(x)

    # ---- lane packing for small D: k logical rows per 128-lane physical row ----
    if d <= _LANE // 2:
        k = _LANE // d               # >= 2
        lane_used = k * d            # <= 128
        lane = _LANE
    else:
        k = 1
        lane_used = d
        lane = d                     # full-array lane dim (allowed even if not %128)

    if k > 1:
        n_pad = _round_up(n, k)
        xr = x if n_pad == n else jnp.pad(x, ((0, n_pad - n), (0, 0)))  # < k rows
        n_rows = n_pad // k
        xp = xr.reshape(n_rows, lane_used)                 # free (row-major) reshape
        if lane_used != _LANE:
            xp = jnp.pad(xp, ((0, 0), (0, _LANE - lane_used)))
    else:
        n_rows = n
        xp = x

    # ---- row-tile sizing ----
    row_bytes = lane * itemsize
    tile_rows = max(_ROW_ALIGN,
                    (target_tile_bytes // row_bytes) // _ROW_ALIGN * _ROW_ALIGN)
    rows_aligned = _round_up(n_rows, _ROW_ALIGN)
    tile_rows = min(tile_rows, rows_aligned)
    if rows_aligned >= _MIN_GRID_STEPS * _ROW_ALIGN:
        # Keep >= _MIN_GRID_STEPS grid steps when there is enough work so each
        # v7x TensorCore gets >= 2 steps (DMA/compute overlap per core).
        tile_rows = min(tile_rows,
                        _round_up(_cdiv(rows_aligned, _MIN_GRID_STEPS), _ROW_ALIGN))

    grid = (_cdiv(n_rows, tile_rows),)   # partial last block: OOB reads padded, writes masked
    compiler_params = pltpu.CompilerParams(
        dimension_semantics=("parallel",),
        vmem_limit_bytes=_VMEM_LIMIT_BYTES,
    )
    out_shape = jax.ShapeDtypeStruct((n_rows, lane), x.dtype)

    if k > 1:
        # Block-diagonal 0/1 group matrix, built once (constant) and kept
        # VMEM-resident across all grid steps via a constant index_map.
        gi = np.arange(_LANE) // d
        valid = np.arange(_LANE) < lane_used
        grp_np = ((gi[:, None] == gi[None, :])
                  & valid[:, None] & valid[None, :]).astype(np.float32)
        grp = jnp.asarray(grp_np)

        out = pl.pallas_call(
            _l2norm_packed_kernel,
            out_shape=out_shape,
            grid_spec=pltpu.PrefetchScalarGridSpec(
                num_scalar_prefetch=0,
                grid=grid,
                in_specs=[
                    pl.BlockSpec((_LANE, _LANE), lambda i: (0, 0)),        # grp (resident)
                    pl.BlockSpec((tile_rows, lane), lambda i: (i, 0)),     # x tile
                ],
                out_specs=pl.BlockSpec((tile_rows, lane), lambda i: (i, 0)),
            ),
            compiler_params=compiler_params,
        )(grp, xp)

        if lane_used != _LANE:
            out = out[:, :lane_used]
        out = out.reshape(n_rows * k, d)
        if n_rows * k != n:
            out = out[:n]
        return out

    out = pl.pallas_call(
        _l2norm_plain_kernel,
        out_shape=out_shape,
        grid_spec=pltpu.PrefetchScalarGridSpec(
            num_scalar_prefetch=0,
            grid=grid,
            in_specs=[pl.BlockSpec((tile_rows, lane), lambda i: (i, 0))],
            out_specs=pl.BlockSpec((tile_rows, lane), lambda i: (i, 0)),
        ),
        compiler_params=compiler_params,
    )(xp)
    return out


if __name__ == "__main__":
    key = jax.random.PRNGKey(0)
    # Shapes consistent with the module's [num_nodes, feature_dim] usage:
    #   (16, 32)   packed path (k=4), single partial block
    #   (19, 48)   generalized packing (k=2, lanes padded 96->128) + row pad
    #   (24, 256)  plain path, lane-aligned D
    #   (1000, 256) plain path, multi-step grid with a partial tail block
    #   (6890, 64) FAUST-sized nodes, packed path (k=2), multi-step grid
    shapes = [(16, 32), (19, 48), (24, 256), (1000, 256), (6890, 64)]
    for i, (n, d) in enumerate(shapes):
        x = jax.random.normal(jax.random.fold_in(key, i), (n, d), dtype=jnp.float32)
        ref = x / jnp.sqrt(jnp.sum(x * x, axis=1, keepdims=True))

        out = jax.block_until_ready(l2_norm(x, force_pallas=True))  # always run the kernel
        assert out.shape == x.shape and out.dtype == x.dtype, (n, d)
        assert jnp.allclose(out, ref, atol=1e-5, rtol=1e-5), (n, d)

        out2 = jax.block_until_ready(l2_norm(x))  # default dispatch (may use XLA fallback)
        assert jnp.allclose(out2, ref, atol=1e-5, rtol=1e-5), (n, d)
    print("KERNEL_OK")
</pallas_src>

<mosaic_0001>
module attributes {stable_mosaic.version = 11 : i64} {
  func.func @_l2norm_packed_kernel(%arg0: i32, %arg1: memref<128x128xf32, #tpu.memory_space<vmem>>, %arg2: memref<32x128xf32, #tpu.memory_space<vmem>>, %arg3: memref<32x128xf32, #tpu.memory_space<vmem>>) attributes {dimension_semantics = [#tpu.dimension_semantics<parallel>], iteration_bounds = array<i64: 1>, scalar_prefetch = 0 : i64, scratch_operands = 0 : i64, tpu.core_type = #tpu.core_type<tc>, window_params = [{pipeline_mode = #tpu.pipeline_mode<synchronous>, transform_indices = @transform_0, window_bounds = array<i64: 128, 128>}, {transform_indices = @transform_1, window_bounds = array<i64: 32, 128>}, {transform_indices = @transform_2, window_bounds = array<i64: 32, 128>}]} {
    %c0 = arith.constant 0 : index
    %c0_0 = arith.constant 0 : index
    %0 = vector.load %arg2[%c0, %c0_0] : memref<32x128xf32, #tpu.memory_space<vmem>>, vector<32x128xf32>
    %1 = arith.mulf %0, %0 : vector<32x128xf32>
    %c0_1 = arith.constant 0 : index
    %c0_2 = arith.constant 0 : index
    %2 = vector.load %arg1[%c0_1, %c0_2] : memref<128x128xf32, #tpu.memory_space<vmem>>, vector<128x128xf32>
    %cst = arith.constant dense<0.000000e+00> : vector<32x128xf32>
    %3 = tpu.matmul %1, %2, %cst {dimension_numbers = #tpu.dot_dimension_numbers<[1], [0], [0], [1], [0, 0, 1, 1], [], []>, precision = #tpu.contract_precision<fp32>} : vector<32x128xf32>, vector<128x128xf32>, vector<32x128xf32> -> vector<32x128xf32>
    %4 = math.rsqrt %3 : vector<32x128xf32>
    %5 = arith.mulf %0, %4 : vector<32x128xf32>
    %c0_3 = arith.constant 0 : index
    %c0_4 = arith.constant 0 : index
    %6 = vector.load %arg3[%c0_3, %c0_4] : memref<32x128xf32, #tpu.memory_space<vmem>>, vector<32x128xf32>
    tpu.vector_store %arg3[%c0_3, %c0_4], %5 {strides = array<i32>} : memref<32x128xf32, #tpu.memory_space<vmem>>, vector<32x128xf32>,
    return
  }
  func.func @transform_0(%arg0: i32) -> (i32, i32) {
    %c0_i32 = arith.constant 0 : i32
    %c0_i32_0 = arith.constant 0 : i32
    %c0_i32_1 = arith.constant 0 : i32
    return %c0_i32, %c0_i32_0 : i32, i32
  }
  func.func @transform_1(%arg0: i32) -> (i32, i32) {
    %c0_i32 = arith.constant 0 : i32
    %c0_i32_0 = arith.constant 0 : i32
    return %arg0, %c0_i32 : i32, i32
  }
  func.func @transform_2(%arg0: i32) -> (i32, i32) {
    %c0_i32 = arith.constant 0 : i32
    %c0_i32_0 = arith.constant 0 : i32
    return %arg0, %c0_i32 : i32, i32
  }
}

</mosaic_0001>

<bundles_post_ra>
// kernel: tpu_custom_call.1
= control target key start
LH: loop header
LB: loop body
LE: loop exit
PB: predicated region body
PF: predicated region fallthrough
CT: control target
= control target key end

     0   :  { %7 = vsyncpa [#allocation3], 0  ;;  %s1730_s0 = inlined_call_operand.hbm [shape: f32[128,128], index: 0, kind: input, shape index: {}]   ;;  %s1731_s1 = inlined_call_operand.hbm [shape: f32[4,128], index: 1, kind: input, shape index: {}]   ;;  %s1732_s2 = inlined_call_operand.hbm [shape: f32[4,128], index: 2, kind: output, shape index: {}]  }
   0x1   :  { %8 = vsyncpa [#allocation6], 0 }
   0x2   :  { %9 = vsyncpa [#allocation4], 0  ;;  %s1293_s9 = smov [#allocation2]  }
   0x3   :  { %s15_s10 = sshll.u32 %s1293_s9, 4  ;;  %s16_s10 = int_to_ptr.vmem [resolvable:$true] %s15_s10 }
   0x4   :  { %s1235_s11 = scalar_lea.vmem %s16_s10, 2048  ;;  %p1240_p1 = scmp.lt.s32.totalorder %s16_s10, %s16_s10 }
   0x5   :  { %p1236_p0 = scmp.ne.s32.totalorder %s16_s10, %s1235_s11  ;;  %p1241_p2 = scmp.lt.s32.totalorder %s1235_s11, %s1235_s11 }
   0x7   :  { %p1242_p3 = por %p1241_p2, %p1240_p1 }
   0x9   :  { %p1243_p4 = pnand %p1242_p3, %p1236_p0 }
   0xb   :  { %1246 = shalt.err (!%p1243_p4)
}
   0xc   :  { %s1294_s12 = smov 128   ;;  %s1295_s13 = smov 8  }
   0xd   :  { %21 = dma.hbm_to_vmem [thread:$0]  %s1730_s0, 2048, %s16_s10, [#allocation3], %s1294_s12, %s1294_s12, %s1295_s13  }
   0xe   :  { %26 = vsyncadd [#allocation6], 448  ;;  %s1296_s16 = smov [#allocation5]  }
   0xf   :  { %s27_s17 = sshll.u32 %s1296_s16, 4  ;;  %s28_s17 = int_to_ptr.vmem [resolvable:$true] %s27_s17 }
  0x10   :  { %s1255_s18 = scalar_lea.vmem %s28_s17, 64  ;;  %s1259_s19 = scalar_lea.vmem %s28_s17, 512 }
  0x11   :  { %p1256_p5 = scmp.ne.s32.totalorder %s28_s17, %s1255_s18  ;;  %p1260_p6 = scmp.lt.s32.totalorder %s28_s17, %s28_s17 }
  0x12   :  { %p1261_p7 = scmp.lt.s32.totalorder %s1259_s19, %s1255_s18 }
  0x14   :  { %p1262_p8 = por %p1261_p7, %p1260_p6 }
  0x16   :  { %p1263_p9 = pnand %p1262_p8, %p1256_p5 }
  0x18   :  { %1266 = shalt.err (!%p1263_p9)
}
  0x19   :  { %s1297_s20 = smov 64   ;;  %s1298_s21 = smov 4  }
  0x1a   :  { %33 = dma.hbm_to_vmem [thread:$0]  %s1731_s1, 64, %s28_s17, [#allocation6], %s1297_s20, %s1297_s20, %s1298_s21  }
  0x1b   :  { %1287 = dma.done.wait [#allocation3], 2048  }
  0x1c   :  { %1288 = vsyncadd [#allocation3], 4294965248 }
  0x1d   :  { %1289 = dma.done.wait [#allocation6], 512  }
  0x1e   :  { %1290 = vsyncadd [#allocation6], 4294966784  ;;  %v63_v0 = vld [vmem:[#allocation2 + $0x78] sm:$0xff]  ;;  %v62_v1 = vld [vmem:[#allocation2 + $0x70] sm:$0xff] }
  0x1f   :  { %v61_v2 = vld [vmem:[#allocation2 + $0x68] sm:$0xff]  ;;  %v1324_v3 = vand.u32 4294901760, %v63_v0  ;;  %v1326_v4 = vand.u32 4294901760, %v62_v1  ;;  %v60_v6 = vld [vmem:[#allocation2 + $0x60] sm:$0xff]  ;;  %v59_v7 = vld [vmem:[#allocation2 + $0x58] sm:$0xff] }
  0x20   :  { %v1328_v5 = vand.u32 4294901760, %v61_v2  ;;  %v58_v8 = vld [vmem:[#allocation2 + $0x50] sm:$0xff]  ;;  %v1330_v9 = vand.u32 4294901760, %v60_v6  ;;  %v1332_v10 = vand.u32 4294901760, %v59_v7  ;;  %v57_v12 = vld [vmem:[#allocation2 + $0x48] sm:$0xff]  ;;  %v56_v13 = vld [vmem:[#allocation2 + $0x40] sm:$0xff] }
  0x21   :  { %v1334_v11 = vand.u32 4294901760, %v58_v8  ;;  %984 = vmatprep.subr.mxu0 %v1324_v3  ;;  %v1338_v14 = vsub.f32 %v63_v0, %v1324_v3  ;;  %v1341_v15 = vsub.f32 %v62_v1, %v1326_v4  ;;  %v1343_v16 = vand.u32 4294901760, %v57_v12  ;;  %v55_v18 = vld [vmem:[#allocation2 + $0x38] sm:$0xff]  ;;  %v54_v28 = vld [vmem:[#allocation2 + $0x30] sm:$0xff]  ;;  %v53_v35 = vld [vmem:[#allocation2 + $0x28] sm:$0xff] }
  0x22   :  { %v1346_v17 = vsub.f32 %v61_v2, %v1328_v5  ;;  %985 = vmatpush3.msra.mxu0 %v1324_v3  ;;  %v1350_v19 = vsub.f32 %v60_v6, %v1330_v9  ;;  %v1353_v20 = vsub.f32 %v59_v7, %v1332_v10  ;;  %v1365_v24 = vand.u32 4294901760, %v56_v13  ;;  %v52_v42 = vld [vmem:[#allocation2 + $0x20] sm:$0xff]  ;;  %v51_v49 = vld [vmem:[#allocation2 + $0x18] sm:$0xff]  ;;  %v1418_v50 = vld [vmem:[#allocation5 + $0x8] sm:$0xff] }
  0x23   :  { %986 = vmatprep.subr.mxu0 %v1326_v4  ;;  %v1357_v21 = vand.u32 4294901760, %v1338_v14  ;;  %v1360_v22 = vand.u32 4294901760, %v1341_v15  ;;  %v1371_v26 = vand.u32 4294901760, %v55_v18  ;;  %v1377_v29 = vsub.f32 %v58_v8, %v1334_v11  ;;  %v1413_v47 = vld [vmem:[#allocation5] sm:$0xff]  ;;  %1738 = vst [vmem:[#allocation12_spill] sm:$0xff] %v1418_v50  ;;  %v50_v60 = vld [vmem:[#allocation2 + $0x10] sm:$0xff] }
  0x24   :  { %v1363_v23 = vand.u32 4294901760, %v1346_v17  ;;  %987 = vmatpush3.msra.mxu0 %v1326_v4  ;;  %v1369_v25 = vand.u32 4294901760, %v1350_v19  ;;  %v1374_v27 = vand.u32 4294901760, %v1353_v20  ;;  %v1387_v33 = vsub.f32 %v57_v12, %v1343_v16  ;;  %1737 = vst [vmem:[#allocation11_spill] sm:$0xff] %v1413_v47  ;;  %v49_v6 = vld [vmem:[#allocation2 + $0x8] sm:$0xff] }
  0x25   :  { %988 = vmatprep.subr.mxu0 %v1328_v5  ;;  %v189_v30 = vsub.f32 %v1338_v14, %v1357_v21  ;;  %v196_v31 = vsub.f32 %v1341_v15, %v1360_v22  ;;  %v1391_v34 = vand.u32 4294901760, %v1377_v29  ;;  %v1396_v39 = vand.u32 4294901760, %v54_v28 }
  0x26   :  { %v203_v32 = vsub.f32 %v1346_v17, %v1363_v23  ;;  %989 = vmatpush3.msra.mxu0 %v1328_v5  ;;  %v210_v38 = vsub.f32 %v1350_v19, %v1369_v25  ;;  %v217_v40 = vsub.f32 %v1353_v20, %v1374_v27  ;;  %v1402_v41 = vand.u32 4294901760, %v1387_v33 }
  0x27   :  { %990 = vmatprep.subr.mxu0 %v1330_v9  ;;  %v190_v36 = vand.u32 4294901760, %v189_v30  ;;  %v197_v37 = vand.u32 4294901760, %v196_v31  ;;  %v1405_v43 = vsub.f32 %v56_v13, %v1365_v24  ;;  %v1408_v45 = vand.u32 4294901760, %v53_v35  ;;  %v48_v30 = vld [vmem:[#allocation2] sm:$0xff] }
  0x28   :  { %991 = vmatpush3.msra.mxu0 %v1330_v9  ;;  %v204_v44 = vand.u32 4294901760, %v203_v32  ;;  %v1411_v46 = vsub.f32 %v55_v18, %v1371_v26  ;;  %v224_v48 = vsub.f32 %v1377_v29, %v1391_v34  ;;  %v211_v51 = vand.u32 4294901760, %v210_v38 }
  0x29   :  { %992 = vmatprep.subr.mxu0 %v1332_v10  ;;  %1022 = vmatprep.subr.mxu1 %v190_v36  ;;  %v1421_v52 = vand.u32 4294901760, %v52_v42  ;;  %v1424_v53 = vand.u32 4294901760, %v1405_v43  ;;  %v1427_v54 = vsub.f32 %v54_v28, %v1396_v39  ;;  %v218_v55 = vand.u32 4294901760, %v217_v40 }
  0x2a   :  { %993 = vmatpush3.msra.mxu0 %v1332_v10  ;;  %1023 = vmatpush3.msra.mxu1 %v190_v36  ;;  %v231_v56 = vsub.f32 %v1387_v33, %v1402_v41  ;;  %v44_v57 = vmul.f32 %v1413_v47, %v1413_v47  ;;  %v1435_v58 = vand.u32 4294901760, %v51_v49  ;;  %v1438_v59 = vand.u32 4294901760, %v1411_v46 }
  0x2b   :  { %994 = vmatprep.subr.mxu0 %v1334_v11  ;;  %1024 = vmatprep.subr.mxu1 %v197_v37  ;;  %v1441_v61 = vsub.f32 %v53_v35, %v1408_v45  ;;  %v45_v62 = vmul.f32 %v1418_v50, %v1418_v50  ;;  %v225_v63 = vand.u32 4294901760, %v224_v48  ;;  %v238_v1 = vsub.f32 %v1405_v43, %v1424_v53 }
  0x2c   :  { %995 = vmatpush3.msra.mxu0 %v1334_v11  ;;  %1025 = vmatpush3.msra.mxu1 %v197_v37  ;;  %v1446_v0 = vand.u32 4294901760, %v44_v57  ;;  %v1452_v2 = vand.u32 4294901760, %v1427_v54  ;;  %v1455_v7 = vsub.f32 %v52_v42, %v1421_v52  ;;  %v232_v12 = vand.u32 4294901760, %v231_v56 }
  0x2d   :  { %996 = vmatprep.subr.mxu0 %v1343_v16  ;;  %1026 = vmatprep.subr.mxu1 %v204_v44  ;;  %v1457_v8 = vand.u32 4294901760, %v45_v62  ;;  %v1460_v13 = vand.u32 4294901760, %v50_v60  ;;  %v245_v18 = vsub.f32 %v1411_v46, %v1438_v59  ;;  %v1466_v28 = vand.u32 4294901760, %v1441_v61 }
  0x2e   :  { %997 = vmatpush3.msra.mxu0 %v1343_v16  ;;  %1027 = vmatpush3.msra.mxu1 %v204_v44  ;;  %v1469_v31 = vsub.f32 %v44_v57, %v1446_v0  ;;  %v1472_v32 = vsub.f32 %v51_v49, %v1435_v58  ;;  %v1475_v35 = vand.u32 4294901760, %v49_v6  ;;  %v239_v37 = vand.u32 4294901760, %v238_v1 }
  0x2f   :  { %998 = vmatprep.subr.mxu0 %v1365_v24  ;;  %1028 = vmatprep.subr.mxu1 %v211_v51  ;;  %v1478_v36 = vsub.f32 %v45_v62, %v1457_v8  ;;  %v252_v38 = vsub.f32 %v1427_v54, %v1452_v2  ;;  %v1484_v40 = vand.u32 4294901760, %v1455_v7  ;;  %v1487_v42 = vand.u32 4294901760, %v48_v30 }
  0x30   :  { %999 = vmatpush3.msra.mxu0 %v1365_v24  ;;  %1029 = vmatpush3.msra.mxu1 %v211_v51  ;;  %v1490_v44 = vsub.f32 %v50_v60, %v1460_v13  ;;  %v246_v48 = vand.u32 4294901760, %v245_v18  ;;  %v259_v49 = vsub.f32 %v1441_v61, %v1466_v28  ;;  %v1733_v51 = vand.u32 4294901760, %v1469_v31 }
  0x31   :  { %1000 = vmatprep.subr.mxu0 %v1371_v26  ;;  %1030 = vmatprep.subr.mxu1 %v218_v55  ;;  %v1734_v56 = vand.u32 4294901760, %v1478_v36  ;;  %v1502_v57 = vsub.f32 %v49_v6, %v1475_v35  ;;  %v253_v60 = vand.u32 4294901760, %v252_v38  ;;  %v266_v62 = vsub.f32 %v1455_v7, %v1484_v40 }
  0x32   :  { %1001 = vmatpush3.msra.mxu0 %v1371_v26  ;;  %1031 = vmatpush3.msra.mxu1 %v218_v55  ;;  %v1497_v55 = vand.u32 4294901760, %v1472_v32  ;;  %v1512_v1 = vsub.f32 %v48_v30, %v1487_v42  ;;  %v260_v6 = vand.u32 4294901760, %v259_v49 }
  0x33   :  { %1002 = vmatprep.subr.mxu0 %v1396_v39  ;;  %1032 = vmatprep.subr.mxu1 %v225_v63  ;;  %v1525_v30 = vand.u32 4294901760, %v1502_v57  ;;  %v267_v38 = vand.u32 4294901760, %v266_v62 }
  0x34   :  { %1003 = vmatpush3.msra.mxu0 %v1396_v39  ;;  %1033 = vmatpush3.msra.mxu1 %v225_v63  ;;  %v1509_v63 = vand.u32 4294901760, %v1490_v44  ;;  %v273_v18 = vsub.f32 %v1472_v32, %v1497_v55 }
  0x35   :  { %1004 = vmatprep.subr.mxu0 %v1408_v45  ;;  %1034 = vmatprep.subr.mxu1 %v232_v12  ;;  %v287_v62 = vsub.f32 %v1502_v57, %v1525_v30 }
  0x36   :  { %1005 = vmatpush3.msra.mxu0 %v1408_v45  ;;  %1035 = vmatpush3.msra.mxu1 %v232_v12  ;;  %v148_v12 = vsub.f32 %v1469_v31, %v1733_v51  ;;  %v280_v49 = vsub.f32 %v1490_v44, %v1509_v63  ;;  %v1532_v51 = vand.u32 4294901760, %v1512_v1 }
  0x37   :  { %1006 = vmatprep.subr.mxu0 %v1421_v52  ;;  %1036 = vmatprep.subr.mxu1 %v239_v37 }
  0x38   :  { %1007 = vmatpush3.msra.mxu0 %v1421_v52  ;;  %1037 = vmatpush3.msra.mxu1 %v239_v37  ;;  %v158_v37 = vsub.f32 %v1478_v36, %v1734_v56  ;;  %v274_v56 = vand.u32 4294901760, %v273_v18  ;;  %v294_v50 = vsub.f32 %v1512_v1, %v1532_v51 }
  0x39   :  { %1008 = vmatprep.subr.mxu0 %v1435_v58  ;;  %1038 = vmatprep.subr.mxu1 %v246_v48 }
  0x3a   :  { %1009 = vmatpush3.msra.mxu0 %v1435_v58  ;;  %1039 = vmatpush3.msra.mxu1 %v246_v48  ;;  %v149_v48 = vand.u32 4294901760, %v148_v12  ;;  %v159_v47 = vand.u32 4294901760, %v158_v37  ;;  %v1544_v12 = vld [vmem:[#allocation5 + $0x10] sm:$0xff]  ;;  %v295_v18 = vand.u32 4294901760, %v294_v50  ;;  %v1547_v37 = vld [vmem:[#allocation5 + $0x18] sm:$0xff] }
  0x3b   :  { %1010 = vmatprep.subr.mxu0 %v1460_v13  ;;  %1040 = vmatprep.subr.mxu1 %v253_v60 }
  0x3c   :  { %1011 = vmatpush3.msra.mxu0 %v1460_v13  ;;  %1041 = vmatpush3.msra.mxu1 %v253_v60  ;;  %v281_v60 = vand.u32 4294901760, %v280_v49 }
  0x3d   :  { %1012 = vmatprep.subr.mxu0 %v1475_v35  ;;  %1042 = vmatprep.subr.mxu1 %v260_v6 }
  0x3e   :  { %1013 = vmatpush3.msra.mxu0 %v1475_v35  ;;  %1043 = vmatpush3.msra.mxu1 %v260_v6  ;;  %v288_v6 = vand.u32 4294901760, %v287_v62 }
  0x3f   :  { %1014 = vmatprep.subr.mxu0 %v1487_v42  ;;  %1044 = vmatprep.subr.mxu1 %v267_v38 }
  0x40   :  { %1015 = vmatpush3.msra.mxu0 %v1487_v42  ;;  %1045 = vmatpush3.msra.mxu1 %v267_v38 }
  0x41   :  { %1016 = vmatprep.mubr.f32.mxu0 %v149_v48  ;;  %1046 = vmatprep.subr.mxu1 %v274_v56 }
  0x42   :  { %1060 = vmatprep.subr.mxu0 %v1338_v14  ;;  %1017 = vmatmul.mubr.f32.vlgmr.msra.gmra.mxu0 %v159_v47  ;;  %v46_v47 = vmul.f32 %v1544_v12, %v1544_v12 }
  0x43   :  { %1047 = vmatpush3.msra.mxu1 %v274_v56  ;;  %1061 = vmatpush3.msra.mxu0 %v1338_v14  ;;  %v47_v14 = vmul.f32 %v1547_v37, %v1547_v37 }
  0x44   :  { %1048 = vmatprep.subr.mxu1 %v281_v60  ;;  %1062 = vmatprep.subr.mxu0 %v1341_v15 }
  0x45   :  { %1049 = vmatpush3.msra.mxu1 %v281_v60  ;;  %1063 = vmatpush3.msra.mxu0 %v1341_v15  ;;  %v1560_v15 = vand.u32 4294901760, %v46_v47  ;;  %v1741_v60 = vld [vmem:[#allocation12_spill] sm:$0xff] }
  0x46   :  { %1050 = vmatprep.subr.mxu1 %v288_v6  ;;  %1064 = vmatprep.subr.mxu0 %v1346_v17 }
  0x47   :  { %1051 = vmatpush3.msra.mxu1 %v288_v6  ;;  %1065 = vmatpush3.msra.mxu0 %v1346_v17  ;;  %v1564_v17 = vand.u32 4294901760, %v47_v14 }
  0x48   :  { %1052 = vmatprep.subr.mxu1 %v295_v18  ;;  %1066 = vmatprep.subr.mxu0 %v1350_v19 }
  0x49   :  { %1053 = vmatpush3.msra.mxu1 %v295_v18  ;;  %1054 = vmatprep.mubr.f32.mxu1 %v1446_v0  ;;  %v1578_v50 = vsub.f32 %v47_v14, %v1564_v17 }
  0x4a   :  { %1067 = vmatpush3.msra.mxu0 %v1350_v19  ;;  %1055 = vmatmul.mubr.f32.vlgmr.msra.gmra.mxu1 %v1457_v8  ;;  %v1573_v19 = vsub.f32 %v46_v47, %v1560_v15  ;;  %v1742_v47 = vld [vmem:[#allocation11_spill] sm:$0xff] }
  0x4b   :  { %1068 = vmatprep.subr.mxu0 %v1353_v20  ;;  %1098 = vmatprep.subr.mxu1 %v1324_v3 }
  0x4c   :  { %1069 = vmatpush3.msra.mxu0 %v1353_v20  ;;  %1099 = vmatpush3.msra.mxu1 %v1324_v3  ;;  %v167_v20 = vand.u32 4294901760, %v1573_v19 }
  0x4d   :  { %1070 = vmatprep.subr.mxu0 %v1377_v29  ;;  %1100 = vmatprep.subr.mxu1 %v1326_v4 }
  0x4e   :  { %1071 = vmatpush3.msra.mxu0 %v1377_v29  ;;  %1101 = vmatpush3.msra.mxu1 %v1326_v4  ;;  %v177_v29 = vand.u32 4294901760, %v1578_v50 }
  0x4f   :  { %1072 = vmatprep.subr.mxu0 %v1387_v33  ;;  %1102 = vmatprep.subr.mxu1 %v1328_v5 }
  0x50   :  { %1073 = vmatpush3.msra.mxu0 %v1387_v33  ;;  %1103 = vmatpush3.msra.mxu1 %v1328_v5  ;;  %v168_v33 = vsub.f32 %v1573_v19, %v167_v20 }
  0x51   :  { %1074 = vmatprep.subr.mxu0 %v1405_v43  ;;  %1104 = vmatprep.subr.mxu1 %v1330_v9 }
  0x52   :  { %1075 = vmatpush3.msra.mxu0 %v1405_v43  ;;  %1105 = vmatpush3.msra.mxu1 %v1330_v9  ;;  %v178_v43 = vsub.f32 %v1578_v50, %v177_v29 }
  0x53   :  { %1076 = vmatprep.subr.mxu0 %v1411_v46  ;;  %1106 = vmatprep.subr.mxu1 %v1332_v10 }
  0x54   :  { %1077 = vmatpush3.msra.mxu0 %v1411_v46  ;;  %1107 = vmatpush3.msra.mxu1 %v1332_v10  ;;  %v169_v46 = vand.u32 4294901760, %v168_v33 }
  0x55   :  { %1078 = vmatprep.subr.mxu0 %v1427_v54  ;;  %1108 = vmatprep.subr.mxu1 %v1334_v11 }
  0x56   :  { %1079 = vmatpush3.msra.mxu0 %v1427_v54  ;;  %1109 = vmatpush3.msra.mxu1 %v1334_v11  ;;  %v179_v54 = vand.u32 4294901760, %v178_v43 }
  0x57   :  { %1080 = vmatprep.subr.mxu0 %v1441_v61  ;;  %1110 = vmatprep.subr.mxu1 %v1343_v16 }
  0x58   :  { %1081 = vmatpush3.msra.mxu0 %v1441_v61  ;;  %1111 = vmatpush3.msra.mxu1 %v1343_v16 }
  0x59   :  { %1082 = vmatprep.subr.mxu0 %v1455_v7  ;;  %1112 = vmatprep.subr.mxu1 %v1365_v24 }
  0x5a   :  { %1083 = vmatpush3.msra.mxu0 %v1455_v7  ;;  %1113 = vmatpush3.msra.mxu1 %v1365_v24 }
  0x5b   :  { %1084 = vmatprep.subr.mxu0 %v1472_v32  ;;  %1114 = vmatprep.subr.mxu1 %v1371_v26 }
  0x5c   :  { %1085 = vmatpush3.msra.mxu0 %v1472_v32  ;;  %1115 = vmatpush3.msra.mxu1 %v1371_v26 }
  0x5d   :  { %1086 = vmatprep.subr.mxu0 %v1490_v44  ;;  %1116 = vmatprep.subr.mxu1 %v1396_v39 }
  0x5e   :  { %1019 = vmatprep.mubr.f32.mxu0 %v169_v46  ;;  %1087 = vmatpush3.msra.mxu0 %v1490_v44 }
  0x5f   :  { %1117 = vmatpush3.msra.mxu1 %v1396_v39  ;;  %1020 = vmatmul.mubr.f32.gmra.mxu0 %v179_v54 }
  0x60   :  { %1088 = vmatprep.subr.mxu0 %v1502_v57  ;;  %1118 = vmatprep.subr.mxu1 %v1408_v45 }
  0x61   :  { %1089 = vmatpush3.msra.mxu0 %v1502_v57  ;;  %1119 = vmatpush3.msra.mxu1 %v1408_v45 }
  0x62   :  { %1090 = vmatprep.subr.mxu0 %v1512_v1  ;;  %1120 = vmatprep.subr.mxu1 %v1421_v52 }
  0x63   :  { %1091 = vmatpush3.msra.mxu0 %v1512_v1  ;;  %1092 = vmatprep.mubr.f32.mxu0 %v1469_v31 }
  0x64   :  { %1121 = vmatpush3.msra.mxu1 %v1421_v52  ;;  %1057 = vmatprep.mubr.f32.mxu1 %v1560_v15 }
  0x65   :  { %1093 = vmatmul.mubr.f32.vlgmr.msra.gmra.mxu0 %v1478_v36  ;;  %1122 = vmatprep.subr.mxu1 %v1435_v58 }
  0x66   :  { %1136 = vmatprep.subr.mxu0 %v1357_v21  ;;  %1058 = vmatmul.mubr.f32.gmra.mxu1 %v1564_v17 }
  0x67   :  { %1123 = vmatpush3.msra.mxu1 %v1435_v58  ;;  %1137 = vmatpush3.msra.mxu0 %v1357_v21  ;;  %v1739_v21 = vand.u32 4294901760, %v1469_v31 }
  0x68   :  { %1124 = vmatprep.subr.mxu1 %v1460_v13  ;;  %1138 = vmatprep.subr.mxu0 %v1360_v22 }
  0x69   :  { %1095 = vmatprep.mubr.f32.mxu0 %v1573_v19  ;;  %1125 = vmatpush3.msra.mxu1 %v1460_v13 }
  0x6a   :  { %1139 = vmatpush3.msra.mxu0 %v1360_v22  ;;  %1126 = vmatprep.subr.mxu1 %v1475_v35  ;;  %v1740_v22 = vand.u32 4294901760, %v1478_v36 }
  0x6b   :  { %1096 = vmatmul.mubr.f32.gmra.mxu0 %v1578_v50  ;;  %1140 = vmatprep.subr.mxu0 %v1363_v23 }
  0x6c   :  { %1127 = vmatpush3.msra.mxu1 %v1475_v35  ;;  %1141 = vmatpush3.msra.mxu0 %v1363_v23 }
  0x6d   :  { %1128 = vmatprep.subr.mxu1 %v1487_v42  ;;  %1142 = vmatprep.subr.mxu0 %v1369_v25 }
  0x6e   :  { %1129 = vmatpush3.msra.mxu1 %v1487_v42  ;;  %1130 = vmatprep.mubr.f32.mxu1 %v1739_v21 }
  0x6f   :  { %1143 = vmatpush3.msra.mxu0 %v1369_v25  ;;  %1131 = vmatmul.mubr.f32.vlgmr.msra.gmra.mxu1 %v1740_v22 }
  0x70   :  { %1144 = vmatprep.subr.mxu0 %v1374_v27  ;;  %1174 = vmatprep.subr.mxu1 %v1324_v3 }
  0x71   :  { %1145 = vmatpush3.msra.mxu0 %v1374_v27  ;;  %1175 = vmatpush3.msra.mxu1 %v1324_v3 }
  0x72   :  { %1146 = vmatprep.subr.mxu0 %v1391_v34  ;;  %1176 = vmatprep.subr.mxu1 %v1326_v4 }
  0x73   :  { %1133 = vmatprep.mubr.f32.mxu1 %v167_v20  ;;  %1147 = vmatpush3.msra.mxu0 %v1391_v34 }
  0x74   :  { %1177 = vmatpush3.msra.mxu1 %v1326_v4  ;;  %1148 = vmatprep.subr.mxu0 %v1402_v41 }
  0x75   :  { %1134 = vmatmul.mubr.f32.gmra.mxu1 %v177_v29  ;;  %1178 = vmatprep.subr.mxu1 %v1328_v5 }
  0x76   :  { %1149 = vmatpush3.msra.mxu0 %v1402_v41  ;;  %1179 = vmatpush3.msra.mxu1 %v1328_v5 }
  0x77   :  { %1150 = vmatprep.subr.mxu0 %v1424_v53  ;;  %1180 = vmatprep.subr.mxu1 %v1330_v9 }
  0x78   :  { %1151 = vmatpush3.msra.mxu0 %v1424_v53  ;;  %1181 = vmatpush3.msra.mxu1 %v1330_v9 }
  0x79   :  { %1152 = vmatprep.subr.mxu0 %v1438_v59  ;;  %1182 = vmatprep.subr.mxu1 %v1332_v10 }
  0x7a   :  { %1153 = vmatpush3.msra.mxu0 %v1438_v59  ;;  %1183 = vmatpush3.msra.mxu1 %v1332_v10 }
  0x7b   :  { %1154 = vmatprep.subr.mxu0 %v1452_v2  ;;  %1184 = vmatprep.subr.mxu1 %v1334_v11 }
  0x7c   :  { %1155 = vmatpush3.msra.mxu0 %v1452_v2  ;;  %1185 = vmatpush3.msra.mxu1 %v1334_v11 }
  0x7d   :  { %1156 = vmatprep.subr.mxu0 %v1466_v28  ;;  %1186 = vmatprep.subr.mxu1 %v1343_v16 }
  0x7e   :  { %1157 = vmatpush3.msra.mxu0 %v1466_v28  ;;  %1187 = vmatpush3.msra.mxu1 %v1343_v16 }
  0x7f   :  { %1158 = vmatprep.subr.mxu0 %v1484_v40  ;;  %1188 = vmatprep.subr.mxu1 %v1365_v24 }
  0x80   :  { %1159 = vmatpush3.msra.mxu0 %v1484_v40  ;;  %1189 = vmatpush3.msra.mxu1 %v1365_v24 }
  0x81   :  { %1160 = vmatprep.subr.mxu0 %v1497_v55  ;;  %1190 = vmatprep.subr.mxu1 %v1371_v26 }
  0x82   :  { %1161 = vmatpush3.msra.mxu0 %v1497_v55  ;;  %1191 = vmatpush3.msra.mxu1 %v1371_v26 }
  0x83   :  { %1162 = vmatprep.subr.mxu0 %v1509_v63  ;;  %1192 = vmatprep.subr.mxu1 %v1396_v39 }
  0x84   :  { %1163 = vmatpush3.msra.mxu0 %v1509_v63  ;;  %1193 = vmatpush3.msra.mxu1 %v1396_v39 }
  0x85   :  { %1164 = vmatprep.subr.mxu0 %v1525_v30  ;;  %1194 = vmatprep.subr.mxu1 %v1408_v45 }
  0x86   :  { %1165 = vmatpush3.msra.mxu0 %v1525_v30  ;;  %1195 = vmatpush3.msra.mxu1 %v1408_v45 }
  0x87   :  { %1166 = vmatprep.subr.mxu0 %v1532_v51  ;;  %1196 = vmatprep.subr.mxu1 %v1421_v52 }
  0x88   :  { %1167 = vmatpush3.msra.mxu0 %v1532_v51  ;;  %1168 = vmatprep.mubr.f32.mxu0 %v1446_v0 }
  0x89   :  { %1197 = vmatpush3.msra.mxu1 %v1421_v52  ;;  %1169 = vmatmul.mubr.f32.vlgmr.msra.gmra.mxu0 %v1457_v8 }
  0x8a   :  { %1198 = vmatprep.subr.mxu1 %v1435_v58  ;;  %1171 = vmatprep.mubr.f32.mxu0 %v1560_v15 }
  0x8b   :  { %1199 = vmatpush3.msra.mxu1 %v1435_v58  ;;  %1206 = vmatprep.mubr.f32.mxu1 %v1446_v0 }
  0x8c   :  { %1200 = vmatprep.subr.mxu1 %v1460_v13 }
  0x8d   :  { %1201 = vmatpush3.msra.mxu1 %v1460_v13  ;;  %1172 = vmatmul.mubr.f32.gmra.mxu0 %v1564_v17 }
  0x8e   :  { %1202 = vmatprep.subr.mxu1 %v1475_v35 }
  0x8f   :  { %1203 = vmatpush3.msra.mxu1 %v1475_v35 }
  0x90   :  { %1204 = vmatprep.subr.mxu1 %v1487_v42 }
  0x91   :  { %1205 = vmatpush3.msra.mxu1 %v1487_v42 }
  0x92   :  { %1207 = vmatmul.mubr.f32.vlgmr.msra.gmra.mxu1 %v1457_v8 }
  0x93   :  { %1209 = vmatprep.mubr.f32.mxu1 %v1560_v15 }
  0x96   :  { %1210 = vmatmul.mubr.f32.gmra.mxu1 %v1564_v17 }
 0x102   :  { %v1018_v3 = vpop.f32.mrf.mxu0 }
 0x104   :  { %v151_v4 = vpop.f32.mrf.mxu0 }
 0x10a   :  { %v1056_v10 = vpop.f32.mrf.mxu1 }
 0x10b   :  { %v339_v45 = vadd.f32 %v1056_v10, %v1018_v3 }
 0x10c   :  { %v332_v16 = vpop.f32.mrf.mxu1 }
 0x10d   :  { %v333_v58 = vadd.f32 %v332_v16, %v151_v4 }
 0x11f   :  { %v1021_v5 = vpop.f32.mrf.mxu0 }
 0x121   :  { %v171_v9 = vpop.f32.mrf.mxu0 }
 0x125   :  { %v1094_v11 = vpop.f32.mrf.mxu0 }
 0x126   :  { %v1059_v23 = vpop.f32.mrf.mxu1  ;;  %v462_v59 = vadd.f32 %v1094_v11, %v339_v45 }
 0x127   :  { %v454_v24 = vpop.f32.mrf.mxu0  ;;  %v351_v61 = vadd.f32 %v1059_v23, %v1021_v5 }
 0x128   :  { %v344_v25 = vpop.f32.mrf.mxu1  ;;  %v455_v0 = vadd.f32 %v454_v24, %v333_v58 }
 0x129   :  { %v345_v2 = vadd.f32 %v344_v25, %v171_v9 }
 0x12b   :  { %v1097_v26 = vpop.f32.mrf.mxu0 }
 0x12c   :  { %v476_v28 = vadd.f32 %v1097_v26, %v351_v61 }
 0x12d   :  { %v468_v34 = vpop.f32.mrf.mxu0 }
 0x12e   :  { %v469_v36 = vadd.f32 %v468_v34, %v345_v2 }
 0x12f   :  { %v1132_v27 = vpop.f32.mrf.mxu1 }
 0x130   :  { %v573_v7 = vadd.f32 %v1132_v27, %v462_v59 }
 0x131   :  { %v564_v39 = vpop.f32.mrf.mxu1 }
 0x132   :  { %v565_v31 = vadd.f32 %v564_v39, %v455_v0 }
 0x135   :  { %v1135_v52 = vpop.f32.mrf.mxu1 }
 0x136   :  { %v589_v40 = vadd.f32 %v1135_v52, %v476_v28 }
 0x137   :  { %v580_v8 = vpop.f32.mrf.mxu1 }
 0x138   :  { %v581_v56 = vadd.f32 %v580_v8, %v469_v36 }
 0x149   :  { %v1170_v41 = vpop.f32.mrf.mxu0 }
 0x14a   :  { %v714_v32 = vadd.f32 %v1170_v41, %v573_v7 }
 0x14b   :  { %v707_v53 = vpop.f32.mrf.mxu0 }
 0x14c   :  { %v708_v42 = vadd.f32 %v707_v53, %v565_v31 }
 0x14d   :  { %v1173_v13 = vpop.f32.mrf.mxu0 }
 0x14e   :  { %v726_v57 = vadd.f32 %v1173_v13, %v589_v40 }
 0x14f   :  { %v719_v51 = vpop.f32.mrf.mxu0 }
 0x150   :  { %v720_v30 = vadd.f32 %v719_v51, %v581_v56 }
 0x152   :  { %v1208_v35 = vpop.f32.mrf.mxu1 }
 0x153   :  { %v819_v44 = vadd.f32 %v1208_v35, %v714_v32 }
 0x154   :  { %v812_v55 = vpop.f32.mrf.mxu1 }
 0x155   :  { %1219 = vrsqrt.f32 %v819_v44  ;;  %v813_v63 = vadd.f32 %v812_v55, %v708_v42 }
 0x156   :  { %v1211_v1 = vpop.f32.mrf.mxu1 }
 0x157   :  { %1221 = vrsqrt.f32 %v813_v63  ;;  %v831_v38 = vadd.f32 %v1211_v1, %v726_v57 }
 0x158   :  { %v824_v49 = vpop.f32.mrf.mxu1 }
 0x159   :  { %1223 = vrsqrt.f32 %v831_v38  ;;  %v825_v48 = vadd.f32 %v824_v49, %v720_v30 }
 0x15b   :  { %1225 = vrsqrt.f32 %v825_v48 }
 0x162   :  { %v1220_v62 = vpop.eup %1219 }
 0x163   :  { %v839_v6 = vmul.f32 %v1220_v62, %v1741_v60 }
 0x164   :  { %v1222_v18 = vpop.eup %1221 }
 0x165   :  { %843 = vst [vmem:[#allocation7 + $0x8] sm:$0xff] %v839_v6  ;;  %v838_v14 = vmul.f32 %v1222_v18, %v1742_v47 }
 0x166   :  { %v1224_v15 = vpop.eup %1223 }
 0x167   :  { %842 = vst [vmem:[#allocation7] sm:$0xff] %v838_v14  ;;  %v841_v17 = vmul.f32 %v1224_v15, %v1547_v37 }
 0x168   :  { %v1226_v19 = vpop.eup %1225 }
 0x169   :  { %845 = vst [vmem:[#allocation7 + $0x18] sm:$0xff] %v841_v17  ;;  %v840_v50 = vmul.f32 %v1226_v19, %v1544_v12 }
 0x16b   :  { %844 = vst [vmem:[#allocation7 + $0x10] sm:$0xff] %v840_v50 }
 0x16c   :  { %850 = vsyncadd [#allocation4], 448  ;;  %s1299_s0 = smov [#allocation7]  }
 0x16d   :  { %s851_s1 = sshll.u32 %s1299_s0, 4  ;;  %s852_s1 = int_to_ptr.vmem [resolvable:$true] %s851_s1 }
 0x16e   :  { %s1267_s24 = scalar_lea.vmem %s852_s1, 64  ;;  %s1271_s25 = scalar_lea.vmem %s852_s1, 512 }
 0x16f   :  { %p1268_p10 = scmp.ne.s32.totalorder %s852_s1, %s1267_s24  ;;  %p1272_p11 = scmp.lt.s32.totalorder %s852_s1, %s852_s1 }
 0x170   :  { %p1273_p12 = scmp.lt.s32.totalorder %s1271_s25, %s1267_s24 }
 0x172   :  { %p1274_p13 = por %p1273_p12, %p1272_p11 }
 0x174   :  { %p1275_p0 = pnand %p1274_p13, %p1268_p10 }
 0x176   :  { %1278 = shalt.err (!%p1275_p0)
}
 0x177   :  { %857 = dma.vmem_to_hbm [thread:$0]  %s852_s1, 64, %s1732_s2, [#allocation4], %s1297_s20, %s1297_s20, %s1298_s21  }
 0x178   :  { %1291 = dma.done.wait [#allocation4], 512  }
 0x179   :  { %1292 = vsyncadd [#allocation4], 4294966784 }
 0x17a   :  { %861 = vsyncpa [#allocation3], 1 }
 0x17b   :  { %862 = vsyncpa [#allocation6], 1 }
 0x17c   :  { %863 = vsyncpa [#allocation4], 1 }

</bundles_post_ra>
